<compile_context>
chip_gen: v7x
topology: tpu7x:2x2x1
jax: 0.10.0
libtpu: 0.0.40
codegen_flags: <defaults>
</compile_context>

<pallas_src>
import functools

import jax
import jax.numpy as jnp
from jax.experimental import pallas as pl
from jax.experimental.pallas import tpu as pltpu

LANES = 128


def _sigmoid_linear_kernel(x_ref, o_ref, *, inv_two_range):
    # y = clamp(x * 1/(2r) + 0.5, 0, 1) — fused mul-add + clip, pure VPU work.
    x = x_ref[...].astype(jnp.float32)
    y = jnp.clip(x * inv_two_range + 0.5, 0.0, 1.0)
    o_ref[...] = y.astype(o_ref.dtype)


def _sublane_multiple(dtype):
    # Sub-32-bit dtypes pack along sublanes: f32 -> 8, bf16 -> 16, int8 -> 32.
    itemsize = jnp.dtype(dtype).itemsize
    return 8 * max(1, 4 // itemsize)


def _hard_sigmoid_jnp(x, inv_two_range, dtype):
    # Same math as the kernel (f32 accumulate, cast back) for the tiny tail.
    return jnp.clip(x.astype(jnp.float32) * inv_two_range + 0.5, 0.0, 1.0).astype(dtype)


def sigmoid_linear(
    x,
    sig_range,
    *,
    target_block_bytes=8 * 1024 * 1024,
    vmem_limit_bytes=48 * 1024 * 1024,
):
    """Elementwise hard-sigmoid with configurable range, any input shape."""
    orig_shape = x.shape
    dtype = x.dtype
    n = x.size
    if n == 0:
        return x
    itemsize = jnp.dtype(dtype).itemsize
    sub = _sublane_multiple(dtype)
    granule = sub * LANES

    # sig_range is a static module attribute (Python scalar) in the PyTorch spec.
    inv_two_range = float(1.0 / (2.0 * sig_range))

    flat = jnp.ravel(x)
    n_bulk = (n // granule) * granule  # lane+sublane aligned bulk for the kernel
    n_tail = n - n_bulk                # < sub*128 leftover, handled with plain jnp

    bulk_out = None
    if n_bulk > 0:
        rows = n_bulk // LANES
        x2d = (flat if n_tail == 0 else flat[:n_bulk]).reshape(rows, LANES)

        # ~8 MiB row-tile, dtype-aware and sublane-aligned; 2-in + 2-out double
        # buffers -> ~32 MiB VMEM, within the explicit vmem_limit_bytes.
        target_rows = max(sub, (target_block_bytes // (LANES * itemsize)) // sub * sub)
        tr = rows if rows <= target_rows else target_rows
        grid = (pl.cdiv(rows, tr),)  # ragged last row-block is masked by Pallas

        kernel = functools.partial(_sigmoid_linear_kernel, inv_two_range=inv_two_range)

        cost = pl.CostEstimate(
            flops=4 * n_bulk,  # mul + add + min + max per element
            transcendentals=0,
            bytes_accessed=2 * n_bulk * itemsize,
        )

        out2d = pl.pallas_call(
            kernel,
            out_shape=jax.ShapeDtypeStruct((rows, LANES), dtype),
            grid_spec=pltpu.PrefetchScalarGridSpec(
                num_scalar_prefetch=0,
                grid=grid,
                in_specs=[pl.BlockSpec((tr, LANES), lambda i: (i, 0))],
                out_specs=pl.BlockSpec((tr, LANES), lambda i: (i, 0)),
            ),
            compiler_params=pltpu.CompilerParams(
                dimension_semantics=("parallel",),
                vmem_limit_bytes=vmem_limit_bytes,
            ),
            cost_estimate=cost,
            # Elementwise, same shape/dtype: let the output reuse the input
            # HBM buffer (XLA copies only if the input must stay live).
            input_output_aliases={0: 0},
        )(x2d)

        bulk_out = out2d.reshape(-1)
        if n_tail == 0:
            return bulk_out.reshape(orig_shape)

    tail_out = _hard_sigmoid_jnp(flat[n_bulk:], inv_two_range, dtype)
    if bulk_out is None:
        return tail_out.reshape(orig_shape)
    return jnp.concatenate([bulk_out, tail_out]).reshape(orig_shape)


def sigmoid_linear_ref(x, sig_range):
    return jnp.clip(x / (2.0 * sig_range) + 0.5, 0.0, 1.0)


if __name__ == "__main__":
    key = jax.random.PRNGKey(0)
    sig_range = 2.0  # SigmoidLinear(sig_range=2.0)

    # NCHW input, as a conv-net activation would be in the PyTorch module.
    x = jax.random.normal(key, (2, 4, 16, 16), dtype=jnp.float32) * 3.0
    out = jax.block_until_ready(sigmoid_linear(x, sig_range))
    ref = sigmoid_linear_ref(x, sig_range)
    assert out.shape == x.shape and out.dtype == x.dtype
    assert jnp.max(jnp.abs(out - ref)) < 1e-6

    # Ragged (non lane-aligned) input exercises the bulk-kernel + jnp-tail path.
    key2 = jax.random.PRNGKey(1)
    x_ragged = jax.random.normal(key2, (3, 11, 37), dtype=jnp.float32) * 3.0
    out_r = jax.block_until_ready(sigmoid_linear(x_ragged, sig_range))
    ref_r = sigmoid_linear_ref(x_ragged, sig_range)
    assert out_r.shape == x_ragged.shape and out_r.dtype == x_ragged.dtype
    assert jnp.max(jnp.abs(out_r - ref_r)) < 1e-6

    print("KERNEL_OK")
</pallas_src>

<mosaic_0001>
module attributes {stable_mosaic.version = 11 : i64} {
  func.func @_sigmoid_linear_kernel(%arg0: i32, %arg1: memref<16x128xf32, #tpu.memory_space<vmem>>, %arg2: memref<16x128xf32, #tpu.memory_space<vmem>>) attributes {dimension_semantics = [#tpu.dimension_semantics<parallel>], iteration_bounds = array<i64: 1>, scalar_prefetch = 0 : i64, scratch_operands = 0 : i64, tpu.core_type = #tpu.core_type<tc>, window_params = [{transform_indices = @transform_0, window_bounds = array<i64: 16, 128>}, {transform_indices = @transform_1, window_bounds = array<i64: 16, 128>}]} {
    %c0 = arith.constant 0 : index
    %c0_0 = arith.constant 0 : index
    %0 = vector.load %arg1[%c0, %c0_0] : memref<16x128xf32, #tpu.memory_space<vmem>>, vector<16x128xf32>
    %cst = arith.constant 2.500000e-01 : f32
    %1 = vector.broadcast %cst : f32 to vector<16x128xf32>
    %2 = arith.mulf %0, %1 : vector<16x128xf32>
    %cst_1 = arith.constant 5.000000e-01 : f32
    %3 = vector.broadcast %cst_1 : f32 to vector<16x128xf32>
    %4 = arith.addf %2, %3 : vector<16x128xf32>
    %cst_2 = arith.constant 0.000000e+00 : f32
    %cst_3 = arith.constant 1.000000e+00 : f32
    %5 = vector.broadcast %cst_2 : f32 to vector<16x128xf32>
    %6 = arith.maximumf %5, %4 : vector<16x128xf32>
    %7 = vector.broadcast %cst_3 : f32 to vector<16x128xf32>
    %8 = arith.minimumf %7, %6 : vector<16x128xf32>
    %c0_4 = arith.constant 0 : index
    %c0_5 = arith.constant 0 : index
    %9 = vector.load %arg2[%c0_4, %c0_5] : memref<16x128xf32, #tpu.memory_space<vmem>>, vector<16x128xf32>
    tpu.vector_store %arg2[%c0_4, %c0_5], %8 {strides = array<i32>} : memref<16x128xf32, #tpu.memory_space<vmem>>, vector<16x128xf32>,
    return
  }
  func.func @transform_0(%arg0: i32) -> (i32, i32) {
    %c0_i32 = arith.constant 0 : i32
    %c0_i32_0 = arith.constant 0 : i32
    return %arg0, %c0_i32 : i32, i32
  }
  func.func @transform_1(%arg0: i32) -> (i32, i32) {
    %c0_i32 = arith.constant 0 : i32
    %c0_i32_0 = arith.constant 0 : i32
    return %arg0, %c0_i32 : i32, i32
  }
}

</mosaic_0001>

<bundles_post_ra>
// kernel: tpu_custom_call.1
= control target key start
LH: loop header
LB: loop body
LE: loop exit
PB: predicated region body
PF: predicated region fallthrough
CT: control target
= control target key end

     0   :  { %6 = vsyncpa [#allocation3], 0  ;;  %s148_s0 = inlined_call_operand.hbm [shape: f32[16,128], index: 0, kind: input, shape index: {}, may-alias: {0,1}]   ;;  %s149_s1 = inlined_call_operand.hbm [shape: f32[16,128], index: 1, kind: output, shape index: {}, may-alias: {0,1}]  }
   0x1   :  { %7 = vsyncpa [#allocation4], 0  ;;  %s104_s6 = smov [#allocation2]   ;;  %s56_s10 = scalar_lea.hbm %s148_s0, 256 }
   0x2   :  { %s13_s7 = sshll.u32 %s104_s6, 4  ;;  %p57_p0 = scmp.ne.s32.totalorder %s148_s0, %s56_s10  ;;  %s14_s7 = int_to_ptr.vmem [resolvable:$true] %s13_s7 }
   0x3   :  { %p60_p1 = scmp.lt.u32.totalorder %s56_s10, %s148_s0 }
   0x5   :  { %p62_p2 = pnand %p60_p1, %p57_p0 }
   0x7   :  { %65 = shalt.err (!%p62_p2)
}
   0x8   :  { %s66_s15 = scalar_lea.vmem %s14_s7, 256  ;;  %p71_p4 = scmp.lt.s32.totalorder %s14_s7, %s14_s7 }
   0x9   :  { %p67_p3 = scmp.ne.s32.totalorder %s14_s7, %s66_s15  ;;  %p72_p5 = scmp.lt.s32.totalorder %s66_s15, %s66_s15 }
   0xb   :  { %p73_p6 = por %p72_p5, %p71_p4 }
   0xd   :  { %p74_p7 = pnand %p73_p6, %p67_p3 }
   0xf   :  { %77 = shalt.err (!%p74_p7)
}
  0x10   :  { %s105_s16 = smov 128   ;;  %s106_s17 = smov 8  }
  0x11   :  { %19 = dma.hbm_to_vmem [thread:$0]  %s148_s0, 256, %s14_s7, [#allocation3], %s105_s16, %s105_s16, %s106_s17  }
  0x12   :  { %100 = dma.done.wait [#allocation3], 256  }
  0x13   :  { %101 = vsyncadd [#allocation3], 4294967040  ;;  %v23_v0 = vld [vmem:[#allocation2] sm:$0xff]  ;;  %v24_v1 = vld [vmem:[#allocation2 + $0x8] sm:$0xff]  ;;  %s107_s20 = smov [#allocation5]  }
  0x14   :  { %v25_v2 = vmul.f32 0.25, %v23_v0  ;;  %v26_v3 = vmul.f32 0.25, %v24_v1  ;;  %s40_s21 = sshll.u32 %s107_s20, 4  ;;  %s41_s21 = int_to_ptr.vmem [resolvable:$true] %s40_s21 }
  0x15   :  { %s78_s22 = scalar_lea.vmem %s41_s21, 256  ;;  %p83_p9 = scmp.lt.s32.totalorder %s41_s21, %s41_s21 }
  0x16   :  { %v27_v4 = vadd.f32 0.5, %v25_v2  ;;  %v28_v5 = vadd.f32 0.5, %v26_v3  ;;  %p79_p8 = scmp.ne.s32.totalorder %s41_s21, %s78_s22  ;;  %p84_p10 = scmp.lt.s32.totalorder %s78_s22, %s78_s22 }
  0x18   :  { %v29_v6 = vmax.f32 %v27_v4, 0.0  ;;  %v30_v7 = vmax.f32 %v28_v5, 0.0  ;;  %p85_p11 = por %p84_p10, %p83_p9 }
  0x1a   :  { %v31_v8 = vmin.f32 %v29_v6, 1.0  ;;  %v32_v9 = vmin.f32 %v30_v7, 1.0  ;;  %p86_p12 = pnand %p85_p11, %p79_p8 }
  0x1c   :  { %33 = vst [vmem:[#allocation5] sm:$0xff] %v31_v8  ;;  %34 = vst [vmem:[#allocation5 + $0x8] sm:$0xff] %v32_v9 }
  0x1d   :  { %89 = shalt.err (!%p86_p12)
}
  0x1e   :  { %s90_s24 = scalar_lea.hbm %s149_s1, 256 }
  0x1f   :  { %p91_p13 = scmp.ne.s32.totalorder %s149_s1, %s90_s24  ;;  %p94_p0 = scmp.lt.u32.totalorder %s90_s24, %s149_s1 }
  0x21   :  { %p96_p1 = pnand %p94_p0, %p91_p13 }
  0x23   :  { %99 = shalt.err (!%p96_p1)
}
  0x24   :  { %46 = dma.vmem_to_hbm [thread:$0]  %s41_s21, 256, %s149_s1, [#allocation4], %s105_s16, %s105_s16, %s106_s17  }
  0x25   :  { %102 = dma.done.wait [#allocation4], 256  }
  0x26   :  { %103 = vsyncadd [#allocation4], 4294967040 }
  0x27   :  { %50 = vsyncpa [#allocation3], 1 }
  0x28   :  { %51 = vsyncpa [#allocation4], 1 }

</bundles_post_ra>
